<compile_context>
chip_gen: v7x
topology: tpu7x:2x2x1
jax: 0.10.0
libtpu: 0.0.40
codegen_flags: <defaults>
</compile_context>

<pallas_src>
import functools
import math

import jax
import jax.numpy as jnp
from jax.experimental import pallas as pl
from jax.experimental.pallas import tpu as pltpu

HIDDEN = 32
NUM_HEADS = 4
HEAD_DIM = HIDDEN // NUM_HEADS


def attention_kernel(x_ref, wqkv_ref, bqkv_ref, wo_ref, bo_ref, o_ref, *,
                     num_heads, head_dim):
    Bt, S, H = x_ref.shape
    nh, hd = num_heads, head_dim
    cdt = x_ref.dtype            # MXU operand dtype (bf16 by default, f32 for parity)

    x2 = x_ref[...].reshape(Bt * S, H)

    # --- fused Q/K/V projection: one (Bt*S, H) @ (H, 3H) MXU push, f32 accumulation ---
    qkv = jnp.dot(x2, wqkv_ref[...], preferred_element_type=jnp.float32) + bqkv_ref[...]

    def split_heads(t):
        # (Bt*S, H) -> (Bt*nh, S, hd): fold the head axis into the batch dim so every
        # attention matmul is a single batched dot_general (no per-head loop).
        return (t.astype(cdt)
                 .reshape(Bt, S, nh, hd)
                 .swapaxes(1, 2)
                 .reshape(Bt * nh, S, hd))

    # Lane-offset slices at 0 / H / 2H (no (.., 3, nh, hd) relayout of the packed result).
    q = split_heads(qkv[:, 0 * H:1 * H])
    k = split_heads(qkv[:, 1 * H:2 * H])
    v = split_heads(qkv[:, 2 * H:3 * H])

    # --- scores + softmax, all heads at once ---
    s = jnp.einsum("bqd,bkd->bqk", q, k,
                   preferred_element_type=jnp.float32) * (1.0 / math.sqrt(hd))
    s = s - jnp.max(s, axis=-1, keepdims=True)
    e = jnp.exp(s)
    # EUP approx reciprocal (separate bundle slot). ~1e-3 rel error; eval-only choice.
    p = e * pl.reciprocal(jnp.sum(e, axis=-1, keepdims=True), approx=True)

    # --- context, all heads at once ---
    ctx = jnp.einsum("bqk,bkd->bqd", p.astype(cdt), v,
                     preferred_element_type=jnp.float32)        # (Bt*nh, S, hd)

    # --- head merge in-register (no VMEM ctx scratch / masked per-head stores),
    #     then one output-projection matmul ---
    ctx2 = (ctx.astype(cdt)
               .reshape(Bt, nh, S, hd)
               .swapaxes(1, 2)
               .reshape(Bt * S, H))
    out = jnp.dot(ctx2, wo_ref[...], preferred_element_type=jnp.float32) + bo_ref[...]
    # TODO(synk): for production H < 128, write a lane-dense (Bt, S*H) output slab instead.
    o_ref[...] = out.reshape(Bt, S, H).astype(o_ref.dtype)


def attention_forward(hidden_states, params, *, batch_block=None,
                      compute_dtype=jnp.bfloat16):
    """Self-attention forward (kv=None, mask=None). Returns (attention_output, weights=None)."""
    B, S, H = hidden_states.shape
    # >=2 "parallel" grid steps by default: keeps both v7x TensorCores busy and overlaps
    # the per-step x/out block DMA with compute on single-TC chips (v5e/v6e). Weights use
    # constant index_maps so they are DMA'd once and stay resident across steps.
    Bt = batch_block if batch_block is not None else max(1, pl.cdiv(B, 2))

    # Fuse q/k/v weights and biases in the wrapper (pure layout plumbing).
    wqkv = jnp.concatenate([params["wq"], params["wk"], params["wv"]],
                           axis=1).astype(compute_dtype)                                  # (H, 3H)
    bqkv = jnp.concatenate([params["bq"], params["bk"], params["bv"]],
                           axis=0)[None, :].astype(jnp.float32)                           # (1, 3H)
    wo = params["wo"].astype(compute_dtype)                                               # (H, H)
    bo = params["bo"][None, :].astype(jnp.float32)                                        # (1, H)
    x = hidden_states.astype(compute_dtype)

    kernel = functools.partial(attention_kernel, num_heads=NUM_HEADS, head_dim=HEAD_DIM)

    out = pl.pallas_call(
        kernel,
        out_shape=jax.ShapeDtypeStruct((B, S, H), hidden_states.dtype),
        grid=(pl.cdiv(B, Bt),),
        in_specs=[
            pl.BlockSpec((Bt, S, H), lambda i: (i, 0, 0)),
            pl.BlockSpec(wqkv.shape, lambda i: (0, 0)),
            pl.BlockSpec(bqkv.shape, lambda i: (0, 0)),
            pl.BlockSpec(wo.shape, lambda i: (0, 0)),
            pl.BlockSpec(bo.shape, lambda i: (0, 0)),
        ],
        out_specs=pl.BlockSpec((Bt, S, H), lambda i: (i, 0, 0)),
        compiler_params=pltpu.CompilerParams(dimension_semantics=("parallel",)),
    )(x, wqkv, bqkv, wo, bo)

    # vis=False -> attention probabilities are not returned (matches the PyTorch module).
    return out, None


def init_params(key):
    ks = jax.random.split(key, 8)
    scale = 0.1
    return {
        "wq": scale * jax.random.normal(ks[0], (HIDDEN, HIDDEN), jnp.float32),
        "bq": scale * jax.random.normal(ks[1], (HIDDEN,), jnp.float32),
        "wk": scale * jax.random.normal(ks[2], (HIDDEN, HIDDEN), jnp.float32),
        "bk": scale * jax.random.normal(ks[3], (HIDDEN,), jnp.float32),
        "wv": scale * jax.random.normal(ks[4], (HIDDEN, HIDDEN), jnp.float32),
        "bv": scale * jax.random.normal(ks[5], (HIDDEN,), jnp.float32),
        "wo": scale * jax.random.normal(ks[6], (HIDDEN, HIDDEN), jnp.float32),
        "bo": scale * jax.random.normal(ks[7], (HIDDEN,), jnp.float32),
    }


def ref_attention(x, p):
    """Pure-JAX reference mirroring Attention.forward (eval mode, kv=None, mask=None)."""
    B, S, H = x.shape
    q = x @ p["wq"] + p["bq"]
    k = x @ p["wk"] + p["bk"]
    v = x @ p["wv"] + p["bv"]

    def split_heads(t):
        return t.reshape(B, S, NUM_HEADS, HEAD_DIM).transpose(0, 2, 1, 3)

    q, k, v = split_heads(q), split_heads(k), split_heads(v)
    scores = jnp.einsum("bhqd,bhkd->bhqk", q, k) / math.sqrt(HEAD_DIM)
    probs = jax.nn.softmax(scores, axis=-1)
    ctx = jnp.einsum("bhqk,bhkd->bhqd", probs, v)
    ctx = ctx.transpose(0, 2, 1, 3).reshape(B, S, H)
    return ctx @ p["wo"] + p["bo"]


if __name__ == "__main__":
    key = jax.random.PRNGKey(0)
    kx, kp = jax.random.split(key)
    B, S = 2, 8
    x = jax.random.normal(kx, (B, S, HIDDEN), jnp.float32)
    params = init_params(kp)

    ref = ref_attention(x, params)

    # 1) Exact-operand run (f32 MXU operands) -- strict parity check.
    out32, w32 = attention_forward(x, params, compute_dtype=jnp.float32)
    out32 = jax.block_until_ready(out32)
    assert out32.shape == (B, S, HIDDEN)
    assert w32 is None
    err32 = float(jnp.max(jnp.abs(out32 - ref)))
    assert err32 < 2e-3, f"f32-operand mismatch vs reference, max abs err = {err32:e}"

    # 2) Default run (bf16 MXU operands, f32 accumulation) -- looser tolerance due to
    #    bf16 operand rounding (the MXU-native path on v6e/v7x).
    out16, w16 = attention_forward(x, params)
    out16 = jax.block_until_ready(out16)
    assert out16.shape == (B, S, HIDDEN)
    assert w16 is None
    assert bool(jnp.all(jnp.isfinite(out16)))
    err16 = float(jnp.max(jnp.abs(out16 - ref)))
    assert err16 < 5e-2, f"bf16-operand mismatch vs reference, max abs err = {err16:e}"

    print("KERNEL_OK")
</pallas_src>

<mosaic_0001>
module attributes {stable_mosaic.version = 11 : i64} {
  func.func @attention_kernel(%arg0: i32, %arg1: memref<1x8x32xf32, #tpu.memory_space<vmem>>, %arg2: memref<32x96xf32, #tpu.memory_space<vmem>>, %arg3: memref<1x96xf32, #tpu.memory_space<vmem>>, %arg4: memref<32x32xf32, #tpu.memory_space<vmem>>, %arg5: memref<1x32xf32, #tpu.memory_space<vmem>>, %arg6: memref<1x8x32xf32, #tpu.memory_space<vmem>>) attributes {dimension_semantics = [#tpu.dimension_semantics<parallel>], iteration_bounds = array<i64: 2>, scalar_prefetch = 0 : i64, scratch_operands = 0 : i64, tpu.core_type = #tpu.core_type<tc>, window_params = [{transform_indices = @transform_0, window_bounds = array<i64: 1, 8, 32>}, {pipeline_mode = #tpu.pipeline_mode<synchronous>, transform_indices = @transform_1, window_bounds = array<i64: 32, 96>}, {pipeline_mode = #tpu.pipeline_mode<synchronous>, transform_indices = @transform_2, window_bounds = array<i64: 1, 96>}, {pipeline_mode = #tpu.pipeline_mode<synchronous>, transform_indices = @transform_3, window_bounds = array<i64: 32, 32>}, {pipeline_mode = #tpu.pipeline_mode<synchronous>, transform_indices = @transform_4, window_bounds = array<i64: 1, 32>}, {transform_indices = @transform_5, window_bounds = array<i64: 1, 8, 32>}]} {
    %c0 = arith.constant 0 : index
    %c0_0 = arith.constant 0 : index
    %c0_1 = arith.constant 0 : index
    %0 = vector.load %arg1[%c0, %c0_0, %c0_1] : memref<1x8x32xf32, #tpu.memory_space<vmem>>, vector<1x8x32xf32>
    %1 = vector.shape_cast %0 : vector<1x8x32xf32> to vector<8x32xf32>
    %c0_2 = arith.constant 0 : index
    %c0_3 = arith.constant 0 : index
    %2 = vector.load %arg2[%c0_2, %c0_3] : memref<32x96xf32, #tpu.memory_space<vmem>>, vector<32x96xf32>
    %cst = arith.constant dense<0.000000e+00> : vector<8x96xf32>
    %3 = tpu.matmul %1, %2, %cst {dimension_numbers = #tpu.dot_dimension_numbers<[1], [0], [0], [1], [0, 0, 1, 1], [], []>} : vector<8x32xf32>, vector<32x96xf32>, vector<8x96xf32> -> vector<8x96xf32>
    %c0_4 = arith.constant 0 : index
    %c0_5 = arith.constant 0 : index
    %4 = vector.load %arg3[%c0_4, %c0_5] : memref<1x96xf32, #tpu.memory_space<vmem>>, vector<1x96xf32>
    %5 = vector.broadcast %4 : vector<1x96xf32> to vector<8x96xf32>
    %6 = arith.addf %3, %5 : vector<8x96xf32>
    %7 = vector.extract_strided_slice %6 {offsets = [0, 0], sizes = [8, 32], strides = [1, 1]} : vector<8x96xf32> to vector<8x32xf32>
    %8 = vector.shape_cast %7 : vector<8x32xf32> to vector<1x8x4x8xf32>
    %9 = tpu.transpose %8, [0, 2, 1, 3] : vector<1x8x4x8xf32> -> vector<1x4x8x8xf32>
    %10 = vector.shape_cast %9 : vector<1x4x8x8xf32> to vector<4x8x8xf32>
    %11 = vector.extract_strided_slice %6 {offsets = [0, 32], sizes = [8, 32], strides = [1, 1]} : vector<8x96xf32> to vector<8x32xf32>
    %12 = vector.shape_cast %11 : vector<8x32xf32> to vector<1x8x4x8xf32>
    %13 = tpu.transpose %12, [0, 2, 1, 3] : vector<1x8x4x8xf32> -> vector<1x4x8x8xf32>
    %14 = vector.shape_cast %13 : vector<1x4x8x8xf32> to vector<4x8x8xf32>
    %15 = vector.extract_strided_slice %6 {offsets = [0, 64], sizes = [8, 32], strides = [1, 1]} : vector<8x96xf32> to vector<8x32xf32>
    %16 = vector.shape_cast %15 : vector<8x32xf32> to vector<1x8x4x8xf32>
    %17 = tpu.transpose %16, [0, 2, 1, 3] : vector<1x8x4x8xf32> -> vector<1x4x8x8xf32>
    %18 = vector.shape_cast %17 : vector<1x4x8x8xf32> to vector<4x8x8xf32>
    "tpu.trace_start"() <{level = 10 : i32, message = "bqd,bkd->bqk"}> : () -> ()
    %cst_6 = arith.constant dense<0.000000e+00> : vector<4x8x8xf32>
    %19 = tpu.matmul %10, %14, %cst_6 {dimension_numbers = #tpu.dot_dimension_numbers<[2], [2], [1], [1], [0, 0, 0, 1, 1, 1], [0], [0]>} : vector<4x8x8xf32>, vector<4x8x8xf32>, vector<4x8x8xf32> -> vector<4x8x8xf32>
    "tpu.trace_stop"() : () -> ()
    %cst_7 = arith.constant 0.353553385 : f32
    %20 = vector.broadcast %cst_7 : f32 to vector<4x8x8xf32>
    %21 = arith.mulf %19, %20 : vector<4x8x8xf32>
    %cst_8 = arith.constant dense<0xFF800000> : vector<4x8xf32>
    %22 = vector.multi_reduction <maximumf>, %21, %cst_8 [2] : vector<4x8x8xf32> to vector<4x8xf32>
    %23 = vector.shape_cast %22 : vector<4x8xf32> to vector<4x8x1xf32>
    %24 = vector.broadcast %23 : vector<4x8x1xf32> to vector<4x8x8xf32>
    %25 = arith.subf %21, %24 : vector<4x8x8xf32>
    %26 = math.exp %25 : vector<4x8x8xf32>
    %cst_9 = arith.constant dense<0.000000e+00> : vector<4x8xf32>
    %27 = vector.multi_reduction <add>, %26, %cst_9 [2] : vector<4x8x8xf32> to vector<4x8xf32>
    %28 = vector.shape_cast %27 : vector<4x8xf32> to vector<4x8x1xf32>
    %29 = tpu.reciprocal %28 {approx = true} : vector<4x8x1xf32> -> vector<4x8x1xf32>
    %30 = vector.broadcast %29 : vector<4x8x1xf32> to vector<4x8x8xf32>
    %31 = arith.mulf %26, %30 : vector<4x8x8xf32>
    "tpu.trace_start"() <{level = 10 : i32, message = "bqk,bkd->bqd"}> : () -> ()
    %cst_10 = arith.constant dense<0.000000e+00> : vector<4x8x8xf32>
    %32 = tpu.matmul %31, %18, %cst_10 {dimension_numbers = #tpu.dot_dimension_numbers<[2], [1], [1], [2], [0, 0, 0, 1, 1, 2], [0], [0]>} : vector<4x8x8xf32>, vector<4x8x8xf32>, vector<4x8x8xf32> -> vector<4x8x8xf32>
    "tpu.trace_stop"() : () -> ()
    %33 = vector.shape_cast %32 : vector<4x8x8xf32> to vector<1x4x8x8xf32>
    %34 = tpu.transpose %33, [0, 2, 1, 3] : vector<1x4x8x8xf32> -> vector<1x8x4x8xf32>
    %35 = vector.shape_cast %34 : vector<1x8x4x8xf32> to vector<8x32xf32>
    %c0_11 = arith.constant 0 : index
    %c0_12 = arith.constant 0 : index
    %36 = vector.load %arg4[%c0_11, %c0_12] : memref<32x32xf32, #tpu.memory_space<vmem>>, vector<32x32xf32>
    %cst_13 = arith.constant dense<0.000000e+00> : vector<8x32xf32>
    %37 = tpu.matmul %35, %36, %cst_13 {dimension_numbers = #tpu.dot_dimension_numbers<[1], [0], [0], [1], [0, 0, 1, 1], [], []>} : vector<8x32xf32>, vector<32x32xf32>, vector<8x32xf32> -> vector<8x32xf32>
    %c0_14 = arith.constant 0 : index
    %c0_15 = arith.constant 0 : index
    %38 = vector.load %arg5[%c0_14, %c0_15] : memref<1x32xf32, #tpu.memory_space<vmem>>, vector<1x32xf32>
    %39 = vector.broadcast %38 : vector<1x32xf32> to vector<8x32xf32>
    %40 = arith.addf %37, %39 : vector<8x32xf32>
    %41 = vector.shape_cast %40 : vector<8x32xf32> to vector<1x8x32xf32>
    %c0_16 = arith.constant 0 : index
    %c0_17 = arith.constant 0 : index
    %c0_18 = arith.constant 0 : index
    %42 = vector.load %arg6[%c0_16, %c0_17, %c0_18] : memref<1x8x32xf32, #tpu.memory_space<vmem>>, vector<1x8x32xf32>
    tpu.vector_store %arg6[%c0_16, %c0_17, %c0_18], %41 {strides = array<i32>} : memref<1x8x32xf32, #tpu.memory_space<vmem>>, vector<1x8x32xf32>,
    return
  }
  func.func @transform_0(%arg0: i32) -> (i32, i32, i32) {
    %c0_i32 = arith.constant 0 : i32
    %c0_i32_0 = arith.constant 0 : i32
    %c0_i32_1 = arith.constant 0 : i32
    return %arg0, %c0_i32, %c0_i32_0 : i32, i32, i32
  }
  func.func @transform_1(%arg0: i32) -> (i32, i32) {
    %c0_i32 = arith.constant 0 : i32
    %c0_i32_0 = arith.constant 0 : i32
    %c0_i32_1 = arith.constant 0 : i32
    return %c0_i32, %c0_i32_0 : i32, i32
  }
  func.func @transform_2(%arg0: i32) -> (i32, i32) {
    %c0_i32 = arith.constant 0 : i32
    %c0_i32_0 = arith.constant 0 : i32
    %c0_i32_1 = arith.constant 0 : i32
    return %c0_i32, %c0_i32_0 : i32, i32
  }
  func.func @transform_3(%arg0: i32) -> (i32, i32) {
    %c0_i32 = arith.constant 0 : i32
    %c0_i32_0 = arith.constant 0 : i32
    %c0_i32_1 = arith.constant 0 : i32
    return %c0_i32, %c0_i32_0 : i32, i32
  }
  func.func @transform_4(%arg0: i32) -> (i32, i32) {
    %c0_i32 = arith.constant 0 : i32
    %c0_i32_0 = arith.constant 0 : i32
    %c0_i32_1 = arith.constant 0 : i32
    return %c0_i32, %c0_i32_0 : i32, i32
  }
  func.func @transform_5(%arg0: i32) -> (i32, i32, i32) {
    %c0_i32 = arith.constant 0 : i32
    %c0_i32_0 = arith.constant 0 : i32
    %c0_i32_1 = arith.constant 0 : i32
    return %arg0, %c0_i32, %c0_i32_0 : i32, i32, i32
  }
}

</mosaic_0001>

<bundles_post_ra>
// kernel: tpu_custom_call.1
= control target key start
LH: loop header
LB: loop body
LE: loop exit
PB: predicated region body
PF: predicated region fallthrough
CT: control target
= control target key end

     0   :  { %10 = vsyncpa [#allocation3], 0  ;;  %s2634_s0 = inlined_call_operand.hbm [shape: f32[2,8,32], index: 0, kind: input, shape index: {}]   ;;  %s2635_s1 = inlined_call_operand.hbm [shape: f32[32,96], index: 1, kind: input, shape index: {}]   ;;  %s2636_s2 = inlined_call_operand.vmem [shape: f32[1,96], index: 2, kind: input, shape index: {}]   ;;  %s2637_s3 = inlined_call_operand.hbm [shape: f32[32,32], index: 3, kind: input, shape index: {}]   ;;  %s2638_s4 = inlined_call_operand.vmem [shape: f32[1,32], index: 4, kind: input, shape index: {}]   ;;  %s2639_s5 = inlined_call_operand.hbm [shape: f32[2,8,32], index: 5, kind: output, shape index: {}]  }
   0x1   :  { %12 = vsyncpa [#allocation3 + $0x1], 0 }
   0x2   :  { %13 = vsyncpa [#allocation6], 0 }
   0x3   :  { %14 = vsyncpa [#allocation4], 0 }
   0x4   :  { %16 = vsyncpa [#allocation4 + $0x1], 0  ;;  %s2228_s18 = smov 0   ;;  %s2230_s19 = smov 0  }
   0x5   :  { %s2232_s20 = smov 0   ;;  %s2234_s21 = smov 0  }
   0x6 LB: > { %s2249_s22 = sadd.s32 4294967295, %s2177_s21   ;;  %s1783_s23 = sadd.s32 4294967294, %s2177_s21   ;;  %s2177_s21 = sphi %s2234_s21, %s2659_s21   ;;  %s2173_s20 = sphi %s2232_s20, %s2658_s20   ;;  %s2169_s19 = sphi %s2230_s19, %s2657_s19   ;;  %s2165_s18 = sphi %s2228_s18, %s2656_s18  }
   0x7   : > { %p42_p0 = scmp.ne.s32.totalorder %s2169_s19, %s2165_s18  ;;  %p2640_p1 = scmp.eq.s32.totalorder %s2249_s22, 0 }
   0x8   : > { %p156_p3 = scmp.eq.s32.totalorder %s1783_s23, 1  ;;  %p1784_p5 = scmp.ge.s32.totalorder %s2177_s21, 1 }
   0x9   : > { %p2258_p4 = por %p2640_p1, %p42_p0  ;;  %p163_p7 = scmp.lt.s32.totalorder %s2177_s21, 3 }
   0xa   : > { %p2263_p6 = por %p156_p3, %p42_p0  ;;  %s2179_s27 = smov [#allocation5]  }
   0xb   : > { %s2643_s24 = scalar_select %p2258_p4, 1, 0 }
   0xc   : > { %s2644_s25 = scalar_select %p2263_p6, 1, 0 }
   0xd   : > { %p2268_p8 = pnand %p1784_p5, %p163_p7  ;;  %s175_s28 = sshll.u32 %s2179_s27, 4  ;;  %s2272_s28 = int_to_ptr.vmem [resolvable:$true] %s175_s28 }
   0xe   : > { %s2180_s30 = smov [#allocation7]   ;;  %s2021_s9 = scalar_lea.hbm %s2635_s1, 512 }
   0xf   : > { %p1935_p9 = pneg %p2268_p8  ;;  %s191_s6 = sshll.u32 %s2180_s30, 4  ;;  %s2283_s6 = int_to_ptr.vmem [resolvable:$true] %s191_s6 }
  0x10   : > { %p2022_p12 = scmp.ne.s32.totalorder %s2635_s1, %s2021_s9  ;;  %p2028_p5 = scmp.lt.u32.totalorder %s2021_s9, %s2635_s1 }
  0x11   : > { %p2279_p11 = pnand %p1935_p9, %p2640_p1 }
  0x13   : > { %p2023_p13 = pneg %p2279_p11 }
  0x15   : > { %p2024_p0 = pnand %p2023_p13, %p2022_p12 }
  0x17   : > { %p2025_p3 = pneg %p2024_p0 }
  0x19   : > { %p2030_p7 = pnand %p2028_p5, %p2025_p3 }
  0x1b   : > { %2033 = shalt.err (!%p2030_p7)
}
  0x1c   : > { %s2034_s14 = scalar_lea.vmem %s2272_s28, 512  ;;  %p2042_p2 = scmp.lt.s32.totalorder %s2272_s28, %s2272_s28 }
  0x1d   : > { %p2035_p9 = scmp.ne.s32.totalorder %s2272_s28, %s2034_s14  ;;  %p2043_p12 = scmp.lt.s32.totalorder %s2034_s14, %s2034_s14 }
  0x1f   : > { %p2037_p10 = pnand %p2035_p9, %p2023_p13  ;;  %p2044_p0 = por %p2043_p12, %p2042_p2 }
  0x21   : > { %p2038_p1 = pneg %p2037_p10 }
  0x23   : > { %p2045_p6 = pnand %p2044_p0, %p2038_p1 }
  0x25   : > { %2048 = shalt.err (!%p2045_p6)
}
  0x26   : > { %s2181_s15 = smov 128   ;;  %s2182_s16 = smov 8  }
  0x27   : > { %1938 = dma.hbm_to_vmem [thread:$0]  (!%p2279_p11), %s2635_s1, 512, %s2272_s28, [#allocation6], %s2181_s15, %s2181_s15, %s2182_s16  }
  0x28   : > { %s2049_s7 = scalar_lea.hbm %s2637_s3, 512 }
  0x29   : > { %p2050_p2 = scmp.ne.s32.totalorder %s2637_s3, %s2049_s7  ;;  %p2056_p10 = scmp.lt.u32.totalorder %s2049_s7, %s2637_s3 }
  0x2b   : > { %p2052_p1 = pnand %p2050_p2, %p2023_p13 }
  0x2d   : > { %p2053_p6 = pneg %p2052_p1 }
  0x2f   : > { %p2058_p3 = pnand %p2056_p10, %p2053_p6 }
  0x31   : > { %2061 = shalt.err (!%p2058_p3)
}
  0x32   : > { %s2062_s28 = scalar_lea.vmem %s2283_s6, 512  ;;  %p2070_p12 = scmp.lt.s32.totalorder %s2283_s6, %s2283_s6 }
  0x33   : > { %p2063_p5 = scmp.ne.s32.totalorder %s2283_s6, %s2062_s28  ;;  %p2071_p0 = scmp.lt.s32.totalorder %s2062_s28, %s2062_s28 }
  0x35   : > { %p2065_p7 = pnand %p2063_p5, %p2023_p13  ;;  %p2072_p2 = por %p2071_p0, %p2070_p12 }
  0x37   : > { %p2066_p9 = pneg %p2065_p7 }
  0x39   : > { %p2073_p1 = pnand %p2072_p2, %p2066_p9 }
  0x3b   : > { %2076 = shalt.err (!%p2073_p1)
}
  0x3c   : > { %1941 = dma.hbm_to_vmem [thread:$0]  (!%p2279_p11), %s2637_s3, 512, %s2283_s6, [#allocation6], %s2181_s15, %s2181_s15, %s2182_s16  }
  0x3d   : > { %s2338_s14 = sadd.s32 1, %s2177_s21   ;;  %s29_s29 = sadd.s32 1, %s2173_s20 }
  0x3e   : > { %s26_s17 = ssub.s32 %s2177_s21, %s2338_s14  ;;  %p36_p13 = scmp.ne.s32.totalorder %s2173_s20, %s2169_s19 }
  0x3f   : > { %p27_p6 = scmp.eq.s32.totalorder %s26_s17, 0  ;;  %p37_p10 = scmp.eq.s32.totalorder %s2177_s21, 0 }
  0x40   : > { %p2647_p3 = scmp.eq.s32.totalorder %s2249_s22, 1  ;;  %p1952_p7 = scmp.lt.s32.totalorder %s2177_s21, 2 }
  0x41   : > { %s2354_s27 = scalar_select %p27_p6, %s2173_s20, %s29_s29  }
  0x42   : > { %p2348_p5 = por %p2647_p3, %p36_p13  ;;  %p38_p9 = por %p37_p10, %p36_p13 }
  0x43   : > { %s208_s30 = sand.u32 1, %s2173_s20   ;;  %s1789_s6 = sshll.u32 %s2177_s21, 7 }
  0x44   : > { %s2648_s23 = scalar_select %p2348_p5, 1, 0 }
  0x45   : > { %s1788_s7 = sshll.u32 %s208_s30, 3  ;;  %s2361_s8 = scalar_lea.hbm %s2634_s0, %s1789_s6 }
  0x46   : > { %s212_s9 = scalar_lea.vmem [#allocation2], %s1788_s7  ;;  %p2365_p11 = pnand %p1952_p7, %p38_p9 }
  0x47   : > { %s219_s10 = sshll.u32 %s212_s9, 4  ;;  %s209_s28 = scalar_lea.sflag [#allocation3], %s208_s30  ;;  %s2363_s10 = int_to_ptr.vmem [resolvable:$true] %s219_s10 }
  0x48   : > { %s2077_s12 = scalar_lea.hbm %s2361_s8, 128  ;;  %p2079_p0 = pneg %p2365_p11 }
  0x49   : > { %p2078_p12 = scmp.ne.s32.totalorder %s2361_s8, %s2077_s12  ;;  %s2082_s17 = scalar_lea.hbm %s2634_s0, 256 }
  0x4a   : > { %p2083_p13 = scmp.lt.u32.totalorder %s2361_s8, %s2634_s0  ;;  %p2084_p6 = scmp.lt.u32.totalorder %s2082_s17, %s2077_s12 }
  0x4b   : > { %p2080_p2 = pnand %p2079_p0, %p2078_p12  ;;  %p2086_p3 = scmp.lt.u32.totalorder %s2077_s12, %s2361_s8 }
  0x4c   : > { %p2085_p10 = por %p2084_p6, %p2083_p13 }
  0x4d   : > { %p2081_p1 = pneg %p2080_p2 }
  0x4e   : > { %p2087_p7 = por %p2086_p3, %p2085_p10 }
  0x50   : > { %p2088_p9 = pnand %p2087_p7, %p2081_p1 }
  0x52   : > { %2091 = shalt.err (!%p2088_p9)
}
  0x53   : > { %s2092_s30 = scalar_lea.vmem %s2363_s10, 128  ;;  %s2183_s15 = smov [#allocation2]  }
  0x54   : > { %p2093_p12 = scmp.ne.s32.totalorder %s2363_s10, %s2092_s30  ;;  %s2097_s16 = sshll.u32 %s2183_s15, 4  ;;  %s2098_s16 = int_to_ptr.vmem [resolvable:$false] %s2097_s16 }
  0x55   : > { %s2099_s9 = scalar_lea.vmem %s2098_s16, 256  ;;  %p2100_p4 = scmp.lt.s32.totalorder %s2363_s10, %s2098_s16 }
  0x56   : > { %p2095_p2 = pnand %p2093_p12, %p2079_p0  ;;  %p2101_p13 = scmp.lt.s32.totalorder %s2099_s9, %s2092_s30 }
  0x58   : > { %p2096_p5 = pneg %p2095_p2  ;;  %p2102_p6 = por %p2101_p13, %p2100_p4 }
  0x5a   : > { %p2103_p10 = pnand %p2102_p6, %p2096_p5 }
  0x5c   : > { %2106 = shalt.err (!%p2103_p10)
}
  0x5d   : > { %1945 = dma.hbm_to_vmem [thread:$0]  (!%p2365_p11), %s2361_s8, 128, %s2363_s10, %s209_s28  }
  0x5e   : > { %228 = sbr.rel (%p2268_p8) target bundleno = 1716 (0x6b4), region = 40  ;;  %s2397_s12 = sand.u32 (!%p2268_p8), 1, %s2169_s19  }
  0x5f   : > { %s1791_s13 = sshll.u32 (!%p2268_p8), %s2397_s12, 3  ;;  %s231_s29 = scalar_lea.sflag (!%p2268_p8), [#allocation3], %s2397_s12 }
  0x60   : > { %s234_s17 = scalar_lea.vmem (!%p2268_p8), [#allocation2], %s1791_s13  ;;  %p2650_p4 = scmp.ne.s32.totalorder (!%p2268_p8), %s2643_s24, 0 }
  0x65   : > { %2152 = dma.done.wait (%p2650_p4), %s231_s29, 128  }
  0x66   : > { %2154 = vsyncadd (%p2650_p4), %s231_s29, 4294967168  ;;  %p2651_p5 = scmp.eq.s32.totalorder %s2249_s22, 0 }
  0x68   : > { %2156 = dma.done.wait (%p2651_p5), [#allocation6], 1024   ;;  %p2652_p8 = pmov %p2651_p5 }
  0x69   : > { %v2184_v0 = vmov 0.0|0.0   ;;  %vm2185_vm0 = vmmov 0   ;;  %v2186_v1 = vmov 0.0   ;;  %v270_v2 = vld [vmem:[#allocation5] sm:$0xff]  ;;  %v271_v3 = vld [vmem:[#allocation5 + $0x8] sm:$0xff]  ;;  %v272_v4 = vld [vmem:[#allocation5 + $0x10] sm:$0xff]  ;;  %v370_v18 = vlaneseq }
  0x6a   : > { %2158 = vsyncadd (%p2652_p8), [#allocation6], 4294966272  ;;  %1911 = vmatprep.subr.bf16.mxu0 %v2184_v0  ;;  %1857 = vmatprep.mubr.msk.f32.mxu0 %vm2185_vm0, %v2186_v1  ;;  %v1912_v5 = vpack.c.bf16 %v271_v3, %v270_v2  ;;  %v273_v6 = vld [vmem:[#allocation5 + $0x18] sm:$0xff]  ;;  %vm281_vm1 = vcmask 261120   ;;  %v1795_v9 = vld [vmem:[%s2636_s2] ss:$0 sm:$0xff] }
  0x6b   : > { %1860 = vmatprep.subr.mxu1 %v2186_v1  ;;  %1862 = vmatprep.mubr.msk.f32.mxu1 %vm2185_vm0, %v2186_v1  ;;  %v1915_v7 = vpack.c.bf16 %v273_v6, %v272_v4  ;;  %v269_v8 = vld [vmem:[%s234_s17] sm:$0xff]  ;;  %s2187_s8 = smov 104   ;;  %s2188_s10 = smov 120   ;;  %v2191_v16 = vmov 1983009808   ;;  %v371_v20 = vshrl.u32 %v370_v18, 7 }
  0x6c   : > { %1913 = vmatpush3.bf16.msra.mxu0 %v1912_v5  ;;  %s2189_s11 = smov 96   ;;  %s2190_s28 = smov 112   ;;  %v368_v17 = vunpack.c.l.s4 %v2191_v16  ;;  %v2192_v21 = vmov 1934713408   ;;  %vm797_vm2 = vcmask 64512   ;;  %vm1591_vm3 = vcmask 130048  }
  0x6d   : > { %1914 = vmatprep.subr.bf16.mxu0 %v2184_v0  ;;  %v400_v22 = vunpack.c.l.s4 %v2192_v21  ;;  %s2193_s7 = smov 64   ;;  %s2194_s6 = smov 16   ;;  %vm1593_vm4 = vcmask 195584  }
  0x6e   : > { %v369_v19 = vunpack.c.0.s8 %v368_v17  ;;  %s2195_s30 = smov 8   ;;  %s2196_s15 = smov 24  }
  0x6f   : > { %v401_v28 = vunpack.c.0.s8 %v400_v22  ;;  %s1820_s29 = sshll.u32 %s2249_s22, 7  ;;  %s268_s17 = scalar_lea.vmem [#allocation8], %s1791_s13 }
  0x70   : > { %1916 = vmatpush3.bf16.msra.mxu0 %v1915_v7  ;;  %v2444_v25 = vsub.s32 %v369_v19, %v371_v20  ;;  %s1694_s24 = sshll.u32 %s268_s17, 4  ;;  %p2653_p0 = scmp.ne.s32.totalorder %s2648_s23, 0  ;;  %s2591_s24 = int_to_ptr.vmem [resolvable:$true] %s1694_s24 }
  0x71   : > { %1880 = vmatprep.subr.mxu0 %v2186_v1  ;;  %v2454_v33 = vsub.s32 %v401_v28, %v371_v20  ;;  %s2107_s22 = scalar_lea.vmem %s2591_s24, 128  ;;  %s2197_s13 = smov [#allocation8]  }
  0x72   : > { %p2108_p11 = scmp.ne.s32.totalorder %s2591_s24, %s2107_s22 }
  0x73   : > { %1858 = vmatmul.mubr.msk.f32.vlgmr.msra.gmra.mrb[0].mxu0 %vm281_vm1, %v269_v8 }
  0x74   : > { %1882 = vmatprep.mubr.msk.f32.mxu0 %vm2185_vm0, %v2186_v1  ;;  %p2109_p1 = pnand %p2108_p11, %p2653_p0 }
  0x76   : > { %p2110_p3 = pneg %p2109_p1 }
 0x146   : > { %v351_v10 = vpop.f32.mrb[0].mxu0 }
 0x147   : > { %v2425_v11 = vadd.f32 %v1795_v9, %v351_v10  ;;  %v1859_v12 = vpop.f32.mrb[1].mxu0 }
 0x149   : > { %362 = vrot.lane.b32.xlu1 %v2425_v11, %s2187_s8  ;;  %356 = vrot.lane.b32.xlu0 %v2425_v11, %s2188_s10  ;;  %s2589_s10 = scalar_lea.hbm %s2639_s5, %s1820_s29 }
 0x14d   : > { %501 = vrot.lane.b32.xlu1 %v2425_v11, %s2189_s11  ;;  %359 = vrot.lane.b32.xlu0 %v2425_v11, %s2190_s28  ;;  %s2111_s28 = sshll.u32 %s2197_s13, 4  ;;  %s2112_s28 = int_to_ptr.vmem [resolvable:$false] %s2111_s28 }
 0x14e   : > { %p2114_p7 = scmp.lt.s32.totalorder %s2591_s24, %s2112_s28 }
 0x1bb   : > { %v2431_v13 = vpop.permute.xlu0 %356  ;;  %v2434_v14 = vpop.permute.xlu1 %362 }
 0x1bc   : > { %503 = vrot.lane.b32.xlu0 %v2431_v13, %s2189_s11  ;;  %v381_v26 = vcombine.low %v2431_v13, %v2434_v14  ;;  %v382_v27 = vcombine.high %v2431_v13, %v2434_v14 }
 0x1be   : > { %v389_v31 = vrot.slane %v381_v26, %v2444_v25  ;;  %v396_v32 = vrot.slane %v382_v27, %v2444_v25 }
 0x1bf   : > { %v2436_v15 = vpop.permute.xlu0 %359  ;;  %v502_v34 = vpop.permute.xlu1 %501 }
 0x1c0   : > { %507 = vrot.lane.b32.xlu0 %v2434_v14, %s2189_s11  ;;  %505 = vrot.lane.b32.xlu1 %v2436_v15, %s2189_s11  ;;  %v365_v23 = vcombine.low %v2425_v11, %v2436_v15  ;;  %v366_v24 = vcombine.high %v2425_v11, %v2436_v15  ;;  %s1681_s11 = scalar_lea.sflag [#allocation4], %s2397_s12 }
 0x1c2   : > { %v373_v29 = vrot.slane %v365_v23, %v2444_v25  ;;  %v380_v30 = vrot.slane %v366_v24, %v2444_v25 }
 0x1c4   : > { %v397_v35 = vcombine.low %v373_v29, %v389_v31  ;;  %v398_v36 = vcombine.high %v373_v29, %v389_v31  ;;  %v413_v37 = vcombine.low %v380_v30, %v396_v32  ;;  %v414_v38 = vcombine.high %v380_v30, %v396_v32 }
 0x1c6   : > { %v405_v40 = vrot.slane %v397_v35, %v2454_v33  ;;  %v412_v41 = vrot.slane %v398_v36, %v2454_v33  ;;  %v421_v42 = vrot.slane %v413_v37, %v2454_v33  ;;  %v428_v43 = vrot.slane %v414_v38, %v2454_v33 }
 0x1c8   : > { %v433_v54 = vcombine.low %v405_v40, %v412_v41  ;;  %v1797_v55 = vcombine.high %v405_v40, %v412_v41  ;;  %v449_v56 = vcombine.low %v421_v42, %v428_v43  ;;  %v1798_v57 = vcombine.high %v421_v42, %v428_v43 }
 0x1ca   : > { %v440_v4 = vrot.slane %v433_v54, %v2444_v25  ;;  %v448_v5 = vrot.slane %v1797_v55, %v2444_v25  ;;  %v456_v6 = vrot.slane %v449_v56, %v2444_v25  ;;  %v464_v7 = vrot.slane %v1798_v57, %v2444_v25 }
 0x1cc   : > { %v465_v20 = vcombine.low %v440_v4, %v448_v5  ;;  %v481_v21 = vcombine.low %v456_v6, %v464_v7  ;;  %v466_v32 = vcombine.high %v440_v4, %v448_v5 }
 0x1ce   : > { %v473_v27 = vrot.slane %v465_v20, %v2454_v33  ;;  %v489_v28 = vrot.slane %v481_v21, %v2454_v33  ;;  %v480_v40 = vrot.slane %v466_v32, %v2454_v33 }
 0x1d0   : > { %v497_v35 = vcombine.low %v473_v27, %v489_v28 }
 0x22e   : > { %v504_v39 = vpop.permute.xlu0 %503 }
 0x232   : > { %v506_v44 = vpop.permute.xlu1 %505  ;;  %v508_v45 = vpop.permute.xlu0 %507 }
 0x233   : > { %v513_v46 = vcombine.low %v502_v34, %v506_v44  ;;  %v514_v47 = vcombine.high %v502_v34, %v506_v44  ;;  %v529_v48 = vcombine.low %v504_v39, %v508_v45  ;;  %v530_v49 = vcombine.high %v504_v39, %v508_v45 }
 0x234   : > { %v482_v34 = vcombine.high %v456_v6, %v464_v7  ;;  %v498_v39 = vcombine.high %v473_v27, %v489_v28 }
 0x235   : > { %v521_v50 = vrot.slane %v513_v46, %v2444_v25  ;;  %v528_v51 = vrot.slane %v514_v47, %v2444_v25  ;;  %v537_v52 = vrot.slane %v529_v48, %v2444_v25  ;;  %v544_v53 = vrot.slane %v530_v49, %v2444_v25 }
 0x236   : > { %v496_v41 = vrot.slane %v482_v34, %v2454_v33 }
 0x237   : > { %v545_v58 = vcombine.low %v521_v50, %v537_v52  ;;  %v546_v59 = vcombine.high %v521_v50, %v537_v52  ;;  %v561_v60 = vcombine.low %v528_v51, %v544_v53  ;;  %v562_v61 = vcombine.high %v528_v51, %v544_v53 }
 0x238   : > { %v499_v43 = vcombine.low %v480_v40, %v496_v41  ;;  %v500_v45 = vcombine.high %v480_v40, %v496_v41 }
 0x239   : > { %v553_v62 = vrot.slane %v545_v58, %v2454_v33  ;;  %v560_v63 = vrot.slane %v546_v59, %v2454_v33  ;;  %v569_v2 = vrot.slane %v561_v60, %v2454_v33  ;;  %v576_v3 = vrot.slane %v562_v61, %v2454_v33 }
 0x23b   : > { %v581_v8 = vcombine.low %v553_v62, %v560_v63  ;;  %v1799_v9 = vcombine.high %v553_v62, %v560_v63  ;;  %v597_v10 = vcombine.low %v569_v2, %v576_v3  ;;  %v1800_v12 = vcombine.high %v569_v2, %v576_v3 }
 0x23d   : > { %v588_v16 = vrot.slane %v581_v8, %v2444_v25  ;;  %v596_v17 = vrot.slane %v1799_v9, %v2444_v25  ;;  %v604_v18 = vrot.slane %v597_v10, %v2444_v25  ;;  %v612_v19 = vrot.slane %v1800_v12, %v2444_v25 }
 0x23f   : > { %v613_v22 = vcombine.low %v588_v16, %v596_v17  ;;  %v629_v23 = vcombine.low %v604_v18, %v612_v19  ;;  %v614_v29 = vcombine.high %v588_v16, %v596_v17  ;;  %v630_v30 = vcombine.high %v604_v18, %v612_v19 }
 0x241   : > { %v621_v24 = vrot.slane %v613_v22, %v2454_v33  ;;  %v637_v26 = vrot.slane %v629_v23, %v2454_v33  ;;  %v628_v37 = vrot.slane %v614_v29, %v2454_v33  ;;  %v644_v38 = vrot.slane %v630_v30, %v2454_v33 }
 0x243   : > { %v645_v31 = vcombine.low %v621_v24, %v637_v26  ;;  %v646_v36 = vcombine.high %v621_v24, %v637_v26  ;;  %v647_v42 = vcombine.low %v628_v37, %v644_v38  ;;  %v648_v44 = vcombine.high %v628_v37, %v644_v38 }
 0x245   : > { %1861 = vmatpush3.xpose.msk.msra.mxu1 %vm797_vm2, %v645_v31 }
 0x246   : > { %1865 = vmatprep.subr.mxu1 %v2186_v1 }
 0x248   : > { %1863 = vmatmul.mubr.msk.f32.vlgmr.msra.gmra.mrb[0].mxu1 %vm797_vm2, %v497_v35 }
 0x249   : > { %1866 = vmatpush3.xpose.msk.msra.mxu1 %vm797_vm2, %v646_v36  ;;  %1867 = vmatprep.mubr.msk.f32.mxu1 %vm2185_vm0, %v2186_v1 }
 0x24a   : > { %1870 = vmatprep.subr.mxu1 %v2186_v1 }
 0x24c   : > { %1868 = vmatmul.mubr.msk.f32.vlgmr.msra.gmra.mrb[2].mxu1 %vm797_vm2, %v498_v39 }
 0x24d   : > { %1871 = vmatpush3.xpose.msk.msra.mxu1 %vm797_vm2, %v647_v42  ;;  %1872 = vmatprep.mubr.msk.f32.mxu1 %vm2185_vm0, %v2186_v1 }
 0x24e   : > { %1875 = vmatprep.subr.mxu1 %v2186_v1 }
 0x250   : > { %1873 = vmatmul.mubr.msk.f32.vlgmr.msra.gmra.mrb[4].mxu1 %vm797_vm2, %v499_v43 }
 0x251   : > { %1876 = vmatpush3.xpose.msk.msra.mxu1 %vm797_vm2, %v648_v44  ;;  %1877 = vmatprep.mubr.msk.f32.mxu1 %vm2185_vm0, %v2186_v1 }
 0x252   : > { %1885 = vmatprep.subr.mxu1 %v2186_v1 }
 0x254   : > { %1878 = vmatmul.mubr.msk.f32.vlgmr.msra.gmra.mrb[6].mxu1 %vm797_vm2, %v500_v45 }
 0x255   : > { %1887 = vmatprep.mubr.msk.f32.mxu1 %vm2185_vm0, %v2186_v1 }
 0x31b   : > { %v870_v46 = vpop.f32.mrb[0].mxu1 }
 0x31c   : > { %v1102_v47 = vmul.f32 0.35355338, %v870_v46  ;;  %v1864_v48 = vpop.f32.mrb[1].mxu1 }
 0x31e   : > { %v1106_v49 = vsel %vm797_vm2, %v1102_v47, -inf }
 0x31f   : > { %1107 = vmax.xlane.f32.xlu1 %v1106_v49  ;;  %v946_v50 = vpop.f32.mrb[2].mxu1 }
 0x320   : > { %v1103_v51 = vmul.f32 0.35355338, %v946_v50  ;;  %v1869_v52 = vpop.f32.mrb[3].mxu1 }
 0x322   : > { %v1109_v53 = vsel %vm797_vm2, %v1103_v51, -inf }
 0x323   : > { %1110 = vmax.xlane.f32.xlu0 %v1109_v53  ;;  %v1022_v54 = vpop.f32.mrb[4].mxu1 }
 0x324   : > { %v1104_v55 = vmul.f32 0.35355338, %v1022_v54  ;;  %v1874_v56 = vpop.f32.mrb[5].mxu1 }
 0x326   : > { %v1112_v57 = vsel %vm797_vm2, %v1104_v55, -inf }
 0x327   : > { %1113 = vmax.xlane.f32.xlu0 %v1112_v57  ;;  %v1098_v58 = vpop.f32.mrb[6].mxu1 }
 0x328   : > { %v1105_v59 = vmul.f32 0.35355338, %v1098_v58  ;;  %v1879_v60 = vpop.f32.mrb[7].mxu1 }
 0x32a   : > { %v1115_v61 = vsel %vm797_vm2, %v1105_v59, -inf }
 0x32b   : > { %1116 = vmax.xlane.f32.xlu1 %v1115_v61 }
 0x33c   : > { %651 = vrot.lane.b32.xlu1 %v2431_v13, %s2193_s7 }
 0x33d   : > { %649 = vrot.lane.b32.xlu0 %v2425_v11, %s2193_s7 }
 0x3ac   : > { %v1108_v62 = vpop.xlane.xlu1 %1107 }
 0x3ad   : > { %v1118_v63 = vsub.f32 %v1102_v47, %v1108_v62 }
 0x3af   : > { %v1122_v2 = vmul.f32 1.442695, %v1118_v63 }
 0x3b0   : > { %v1111_v3 = vpop.xlane.xlu0 %1110 }
 0x3b1   : > { %2005 = vpow2.f32 %v1122_v2  ;;  %v1119_v4 = vsub.f32 %v1103_v51, %v1111_v3 }
 0x3b3   : > { %v1124_v5 = vmul.f32 1.442695, %v1119_v4 }
 0x3b4   : > { %v1114_v6 = vpop.xlane.xlu0 %1113 }
 0x3b5   : > { %2007 = vpow2.f32 %v1124_v5  ;;  %v1120_v7 = vsub.f32 %v1104_v55, %v1114_v6 }
 0x3b7   : > { %v1126_v8 = vmul.f32 1.442695, %v1120_v7 }
 0x3b8   : > { %v1117_v9 = vpop.xlane.xlu1 %1116  ;;  %v650_v22 = vpop.permute.xlu0 %649 }
 0x3b9   : > { %2009 = vpow2.f32 %v1126_v8  ;;  %v1121_v10 = vsub.f32 %v1105_v59, %v1117_v9 }
 0x3bb   : > { %v2512_v12 = vpop.eup %2005  ;;  %v1128_v13 = vmul.f32 1.442695, %v1121_v10 }
 0x3bc   : > { %v1130_v11 = vsel %vm797_vm2, %v2512_v12, 0.0  ;;  %v652_v23 = vpop.permute.xlu1 %651 }
 0x3bd   : > { %2011 = vpow2.f32 %v1128_v13  ;;  %1131 = vadd.xlane.f32.xlu0 %v1130_v11  ;;  %v1596_v11 = vld [vmem:[#allocation7 + $0x8] sm:$0xff] }
 0x3bf   : > { %v2008_v16 = vpop.eup %2007 }
 0x3c0   : > { %v1133_v17 = vsel %vm797_vm2, %v2008_v16, 0.0 }
 0x3c1   : > { %1134 = vadd.xlane.f32.xlu1 %v1133_v17 }
 0x3c3   : > { %v2517_v18 = vpop.eup %2009 }
 0x3c4   : > { %v1136_v19 = vsel %vm797_vm2, %v2517_v18, 0.0 }
 0x3c5   : > { %1137 = vadd.xlane.f32.xlu0 %v1136_v19 }
 0x3c7   : > { %v2521_v20 = vpop.eup %2011 }
 0x3c8   : > { %v1139_v21 = vsel %vm797_vm2, %v2521_v20, 0.0 }
 0x3c9   : > { %1140 = vadd.xlane.f32.xlu1 %v1139_v21 }
 0x3da   : > { %653 = vrot.lane.b32.xlu1 %v2436_v15, %s2193_s7 }
 0x3db   : > { %655 = vrot.lane.b32.xlu0 %v2434_v14, %s2193_s7  ;;  %s2113_s7 = scalar_lea.vmem %s2112_s28, 256 }
 0x3dc   : > { %p2115_p9 = scmp.lt.s32.totalorder %s2113_s7, %s2107_s22 }
 0x3de   : > { %p2116_p12 = por %p2115_p9, %p2114_p7 }
 0x3e0   : > { %p2117_p2 = pnand %p2116_p12, %p2110_p3 }
 0x44a   : > { %v1132_v24 = vpop.xlane.xlu0 %1131 }
 0x44b   : > { %2013 = vrcp.f32 %v1132_v24 }
 0x44e   : > { %v1135_v26 = vpop.xlane.xlu1 %1134 }
 0x44f   : > { %2015 = vrcp.f32 %v1135_v26 }
 0x452   : > { %v1138_v27 = vpop.xlane.xlu0 %1137 }
 0x453   : > { %2017 = vrcp.f32 %v1138_v27 }
 0x455   : > { %v2014_v54 = vpop.eup %2013 }
 0x456   : > { %v656_v28 = vpop.permute.xlu0 %655  ;;  %v1141_v29 = vpop.xlane.xlu1 %1140  ;;  %v1146_v6 = vmul.f32 %v2014_v54, %v2512_v12  ;;  %v1595_v12 = vld [vmem:[#allocation7] sm:$0xff] }
 0x457   : > { %v677_v30 = vcombine.low %v652_v23, %v656_v28  ;;  %v678_v31 = vcombine.high %v652_v23, %v656_v28  ;;  %2019 = vrcp.f32 %v1141_v29 }
 0x459   : > { %v685_v36 = vrot.slane %v677_v30, %v2444_v25  ;;  %v692_v15 = vrot.slane %v678_v31, %v2444_v25  ;;  %v2016_v59 = vpop.eup %2015 }
 0x45a   : > { %v654_v32 = vpop.permute.xlu1 %653  ;;  %v1147_v7 = vmul.f32 %v2016_v59, %v2008_v16  ;;  %v1918_v16 = vpack.c.bf16 %v1596_v11, %v1595_v12 }
 0x45b   : > { %v661_v34 = vcombine.low %v650_v22, %v654_v32  ;;  %v662_v35 = vcombine.high %v650_v22, %v654_v32 }
 0x45d   : > { %v669_v37 = vrot.slane %v661_v34, %v2444_v25  ;;  %v676_v14 = vrot.slane %v662_v35, %v2444_v25  ;;  %v2018_v62 = vpop.eup %2017 }
 0x45e   : > { %v1148_v10 = vmul.f32 %v2018_v62, %v2517_v18 }
 0x45f   : > { %v693_v38 = vcombine.low %v669_v37, %v685_v36  ;;  %v694_v39 = vcombine.high %v669_v37, %v685_v36  ;;  %v709_v40 = vcombine.low %v676_v14, %v692_v15  ;;  %v710_v41 = vcombine.high %v676_v14, %v692_v15  ;;  %v1597_v15 = vld [vmem:[#allocation7 + $0x10] sm:$0xff]  ;;  %v1598_v37 = vld [vmem:[#allocation7 + $0x18] sm:$0xff] }
 0x461   : > { %v701_v42 = vrot.slane %v693_v38, %v2454_v33  ;;  %v708_v43 = vrot.slane %v694_v39, %v2454_v33  ;;  %v717_v44 = vrot.slane %v709_v40, %v2454_v33  ;;  %v724_v45 = vrot.slane %v710_v41, %v2454_v33  ;;  %v2020_v5 = vpop.eup %2019 }
 0x462   : > { %v1149_v13 = vmul.f32 %v2020_v5, %v2521_v20  ;;  %v1921_v41 = vpack.c.bf16 %v1598_v37, %v1597_v15 }
 0x463   : > { %v729_v46 = vcombine.low %v701_v42, %v708_v43  ;;  %v1801_v47 = vcombine.high %v701_v42, %v708_v43  ;;  %v745_v48 = vcombine.low %v717_v44, %v724_v45  ;;  %v1802_v49 = vcombine.high %v717_v44, %v724_v45 }
 0x465   : > { %v736_v50 = vrot.slane %v729_v46, %v2444_v25  ;;  %v744_v51 = vrot.slane %v1801_v47, %v2444_v25  ;;  %v752_v52 = vrot.slane %v745_v48, %v2444_v25  ;;  %v760_v53 = vrot.slane %v1802_v49, %v2444_v25 }
 0x467   : > { %v761_v55 = vcombine.low %v736_v50, %v744_v51  ;;  %v777_v56 = vcombine.low %v752_v52, %v760_v53  ;;  %v762_v57 = vcombine.high %v736_v50, %v744_v51  ;;  %v778_v58 = vcombine.high %v752_v52, %v760_v53 }
 0x469   : > { %v769_v60 = vrot.slane %v761_v55, %v2454_v33  ;;  %v785_v61 = vrot.slane %v777_v56, %v2454_v33  ;;  %v776_v63 = vrot.slane %v762_v57, %v2454_v33  ;;  %v792_v2 = vrot.slane %v778_v58, %v2454_v33 }
 0x46b   : > { %v793_v3 = vcombine.low %v769_v60, %v785_v61  ;;  %v794_v4 = vcombine.high %v769_v60, %v785_v61  ;;  %v795_v8 = vcombine.low %v776_v63, %v792_v2  ;;  %v796_v9 = vcombine.high %v776_v63, %v792_v2 }
 0x46d   : > { %1881 = vmatpush3.msra.mxu0 %v793_v3  ;;  %1886 = vmatpush3.msra.mxu1 %v794_v4  ;;  %v1817_v4 = vld [vmem:[%s2638_s4] ss:$0 sm:$0xff] }
 0x46e   : > { %1883 = vmatmul.mubr.msk.f32.vlgmr.msra.gmra.mrb[2].mxu0 %vm797_vm2, %v1146_v6  ;;  %1888 = vmatmul.mubr.msk.f32.vlgmr.msra.gmra.mrb[8].mxu1 %vm797_vm2, %v1147_v7 }
 0x46f   : > { %1890 = vmatprep.subr.mxu0 %v2186_v1  ;;  %1895 = vmatprep.subr.mxu1 %v2186_v1 }
 0x470   : > { %1891 = vmatpush3.msra.mxu0 %v795_v8  ;;  %1896 = vmatpush3.msra.mxu1 %v796_v9 }
 0x471   : > { %1892 = vmatprep.mubr.msk.f32.mxu0 %vm2185_vm0, %v2186_v1  ;;  %1897 = vmatprep.mubr.msk.f32.mxu1 %vm2185_vm0, %v2186_v1 }
 0x472   : > { %1893 = vmatmul.mubr.msk.f32.vlgmr.msra.gmra.mrb[4].mxu0 %vm797_vm2, %v1148_v10  ;;  %1898 = vmatmul.mubr.msk.f32.vlgmr.msra.gmra.mrb[10].mxu1 %vm797_vm2, %v1149_v13 }
 0x473   : > { %1917 = vmatprep.subr.bf16.mxu0 %v2184_v0  ;;  %1908 = vmatprep.mubr.msk.f32.mxu0 %vm2185_vm0, %v2186_v1 }
 0x474   : > { %1919 = vmatpush3.bf16.msra.mxu0 %v1918_v16 }
 0x475   : > { %1920 = vmatprep.subr.bf16.mxu0 %v2184_v0 }
 0x478   : > { %1922 = vmatpush3.bf16.msra.mxu0 %v1921_v41 }
 0x541   : > { %v1219_v17 = vpop.f32.mrb[2].mxu0  ;;  %v1292_v18 = vpop.f32.mrb[8].mxu1 }
 0x542   : > { %v1884_v19 = vpop.f32.mrb[3].mxu0  ;;  %v1889_v20 = vpop.f32.mrb[9].mxu1 }
 0x545   : > { %v1365_v21 = vpop.f32.mrb[4].mxu0  ;;  %v1438_v22 = vpop.f32.mrb[10].mxu1 }
 0x546   : > { %v1442_v23 = vcombine.low %v1219_v17, %v1365_v21  ;;  %v1443_v24 = vcombine.high %v1219_v17, %v1365_v21  ;;  %v1458_v26 = vcombine.low %v1292_v18, %v1438_v22  ;;  %v1459_v27 = vcombine.high %v1292_v18, %v1438_v22  ;;  %v1894_v28 = vpop.f32.mrb[5].mxu0  ;;  %v1899_v29 = vpop.f32.mrb[11].mxu1 }
 0x548   : > { %v1450_v1 = vrot.slane %v1442_v23, %v2444_v25  ;;  %v1457_v30 = vrot.slane %v1443_v24, %v2444_v25  ;;  %v1466_v31 = vrot.slane %v1458_v26, %v2444_v25  ;;  %v1473_v0 = vrot.slane %v1459_v27, %v2444_v25 }
 0x54a   : > { %v1474_v32 = vcombine.low %v1450_v1, %v1466_v31  ;;  %v1475_v34 = vcombine.high %v1450_v1, %v1466_v31  ;;  %v1490_v35 = vcombine.low %v1457_v30, %v1473_v0  ;;  %v1491_v36 = vcombine.high %v1457_v30, %v1473_v0 }
 0x54c   : > { %v1482_v14 = vrot.slane %v1474_v32, %v2454_v33  ;;  %v1489_v38 = vrot.slane %v1475_v34, %v2454_v33  ;;  %v1498_v39 = vrot.slane %v1490_v35, %v2454_v33  ;;  %v1505_v40 = vrot.slane %v1491_v36, %v2454_v33 }
 0x54e   : > { %v1510_v42 = vcombine.low %v1482_v14, %v1489_v38  ;;  %v1815_v43 = vcombine.high %v1482_v14, %v1489_v38  ;;  %v1526_v44 = vcombine.low %v1498_v39, %v1505_v40  ;;  %v1816_v45 = vcombine.high %v1498_v39, %v1505_v40 }
 0x550   : > { %v1517_v46 = vrot.slane %v1510_v42, %v2444_v25  ;;  %v1525_v47 = vrot.slane %v1815_v43, %v2444_v25  ;;  %v1533_v48 = vrot.slane %v1526_v44, %v2444_v25  ;;  %v1541_v49 = vrot.slane %v1816_v45, %v2444_v25 }
 0x552   : > { %v1543_v50 = vcombine.high %v1517_v46, %v1525_v47  ;;  %v1559_v51 = vcombine.high %v1533_v48, %v1541_v49  ;;  %v1542_v52 = vcombine.low %v1517_v46, %v1525_v47  ;;  %v1558_v53 = vcombine.low %v1533_v48, %v1541_v49 }
 0x554   : > { %v1557_v54 = vrot.slane %v1543_v50, %v2454_v33  ;;  %v1573_v55 = vrot.slane %v1559_v51, %v2454_v33  ;;  %v1550_v56 = vrot.slane %v1542_v52, %v2454_v33  ;;  %v1566_v57 = vrot.slane %v1558_v53, %v2454_v33 }
 0x556   : > { %v1576_v58 = vcombine.low %v1557_v54, %v1573_v55  ;;  %v1575_v59 = vcombine.high %v1550_v56, %v1566_v57  ;;  %v1577_v60 = vcombine.high %v1557_v54, %v1573_v55  ;;  %v1574_v61 = vcombine.low %v1550_v56, %v1566_v57 }
 0x558   : > { %1583 = vrot.lane.b32.xlu0 %v1576_v58, %s2194_s6  ;;  %1579 = vrot.lane.b32.xlu1 %v1575_v59, %s2195_s30 }
 0x55c   : > { %1587 = vrot.lane.b32.xlu1 %v1577_v60, %s2196_s15 }
 0x5ca   : > { %v1580_v25 = vpop.permute.xlu1 %1579  ;;  %v1584_v62 = vpop.permute.xlu0 %1583 }
 0x5cb   : > { %v1590_v63 = vsel %vm797_vm2, %v1574_v61, %v1580_v25 }
 0x5cc   : > { %v1592_v2 = vsel %vm1591_vm3, %v1590_v63, %v1584_v62 }
 0x5ce   : > { %v1588_v33 = vpop.permute.xlu1 %1587 }
 0x5cf   : > { %v1594_v3 = vsel %vm1593_vm4, %v1592_v2, %v1588_v33 }
 0x5d0   : > { %1909 = vmatmul.mubr.msk.f32.vlgmr.msra.gmra.mrb[6].mxu0 %vm281_vm1, %v1594_v3 }
 0x6a3   : > { %v1675_v5 = vpop.f32.mrb[6].mxu0 }
 0x6a4   : > { %v1676_v6 = vadd.f32 %v1817_v4, %v1675_v5  ;;  %v1910_v7 = vpop.f32.mrb[7].mxu0 }
 0x6a6   : > { %1679 = vst.msk [vmem:[%s268_s17] sm:$0xff] %vm281_vm1, %v1676_v6 }
 0x6a7   : > { %2120 = shalt.err (!%p2117_p2)
}
 0x6a8   : > { %s2121_s12 = scalar_lea.hbm %s2589_s10, 128  ;;  %s2125_s15 = scalar_lea.hbm %s2639_s5, 256 }
 0x6a9   : > { %p2122_p13 = scmp.ne.s32.totalorder %s2589_s10, %s2121_s12  ;;  %p2126_p4 = scmp.lt.u32.totalorder %s2589_s10, %s2639_s5 }
 0x6aa   : > { %p2127_p5 = scmp.lt.u32.totalorder %s2125_s15, %s2121_s12  ;;  %p2129_p11 = scmp.lt.u32.totalorder %s2121_s12, %s2589_s10 }
 0x6ab   : > { %p2123_p6 = pnand %p2122_p13, %p2653_p0 }
 0x6ac   : > { %p2128_p8 = por %p2127_p5, %p2126_p4 }
 0x6ad   : > { %p2124_p10 = pneg %p2123_p6 }
 0x6ae   : > { %p2130_p1 = por %p2129_p11, %p2128_p8 }
 0x6b0   : > { %p2131_p3 = pnand %p2130_p1, %p2124_p10 }
 0x6b2   : > { %2134 = shalt.err (!%p2131_p3)
}
 0x6b3   : > { %1933 = dma.vmem_to_hbm [thread:$0]  (%p2653_p0), %s2591_s24, 128, %s2589_s10, %s1681_s11  }
 0x6b4 PF: > { %s1706_s29 = sand.u32 1, %s2165_s18   ;;  %p2654_p7 = scmp.ne.s32.totalorder %s2644_s25, 0 }
 0x6b5   : > { %p2655_p9 = scmp.ge.s32.totalorder %s2177_s21, 2  ;;  %s1707_s17 = scalar_lea.sflag [#allocation4], %s1706_s29 }
 0x6b7   : > { %p1947_p12 = pnand %p2655_p9, %p2654_p7 }
 0x6b9   : > { %2160 = dma.done.wait (!%p1947_p12), %s1707_s17, 128  }
 0x6ba   : > { %2162 = vsyncadd (!%p1947_p12), %s1707_s17, 4294967168  ;;  %p19_p2 = scmp.ge.s32.totalorder %s2338_s14, 4   ;;  %s2656_s18 = smov %s2169_s19 }
 0x6bb   : > { %s2657_s19 = smov %s2173_s20  ;;  %s2658_s20 = smov %s2354_s27 }
 0x6bc   : > { %s2659_s21 = smov %s2338_s14  ;;  %21 = sbr.rel (!%p19_p2) target bundleno = 6 (0x6), region = 93 }
 0x6c3   :  { %1712 = vsyncpa [#allocation3], 1 }
 0x6c4   :  { %1714 = vsyncpa [#allocation3 + $0x1], 1 }
 0x6c5   :  { %1715 = vsyncpa [#allocation6], 1 }
 0x6c6   :  { %1716 = vsyncpa [#allocation4], 1 }
 0x6c7   :  { %1718 = vsyncpa [#allocation4 + $0x1], 1 }

</bundles_post_ra>
